<compile_context>
chip_gen: v7x
topology: tpu7x:2x2x1
jax: 0.10.0
libtpu: 0.0.40
codegen_flags: <defaults>
</compile_context>

<pallas_src>
import jax
import jax.numpy as jnp
from jax.experimental import pallas as pl
from jax.experimental.pallas import tpu as pltpu


def _round_up(n, m):
    return ((n + m - 1) // m) * m


def actor_kernel(x_ref, w1_ref, b1_ref, w2_ref, b2_ref, w3_ref, b3_ref, out_ref):
    # x_ref: [tb, state_dim]   w1: [state_dim, 64]  w2: [64, 64]  w3: [64, action_dim]
    # b*:    [1, out_features] out_ref: [tb, action_dim]
    x = x_ref[...]

    # fc1 + ReLU  (MXU matmul, f32 accumulation)
    h1 = jnp.dot(x, w1_ref[...], preferred_element_type=jnp.float32) + b1_ref[...]
    h1 = jnp.maximum(h1, 0.0)

    # fc2 + ReLU
    h2 = jnp.dot(h1, w2_ref[...], preferred_element_type=jnp.float32) + b2_ref[...]
    h2 = jnp.maximum(h2, 0.0)

    # fc3 + softmax(dim=-1) over the (unpadded) action lanes.
    logits = jnp.dot(h2, w3_ref[...], preferred_element_type=jnp.float32) + b3_ref[...]
    m = jnp.max(logits, axis=-1, keepdims=True)
    e = jnp.exp(logits - m)
    denom = jnp.sum(e, axis=-1, keepdims=True)
    r = pl.reciprocal(denom, approx=True)   # EUP vrcp (otherwise-idle slot)
    r = r * (2.0 - denom * r)               # one Newton step -> ~1e-7 relative error
    out_ref[...] = (e * r).astype(out_ref.dtype)


def _choose_batch_tile(batch, batch_tile):
    """Pick a batch tile: single tile for small batches; for larger batches use big
    (<=batch_tile) tiles but keep >=2 tiles so v7x's 2 TensorCores both get work."""
    if batch <= 256:
        return _round_up(max(batch, 1), 8)
    half = _round_up(pl.cdiv(batch, 2), 8)
    return min(batch_tile, half)


def actor_forward(x, params, *, batch_tile=1024):
    """x: [batch, state_dim] f32.  params: dict of w1,b1,w2,b2,w3,b3 (JAX-layout
    weights, i.e. [in_features, out_features]).  Returns [batch, action_dim] probs."""
    w1, b1 = params["w1"], params["b1"]
    w2, b2 = params["w2"], params["b2"]
    w3, b3 = params["w3"], params["b3"]
    batch, state_dim = x.shape
    action_dim = w3.shape[1]

    tb = _choose_batch_tile(batch, batch_tile)
    n_tiles = pl.cdiv(batch, tb)

    vmem = pltpu.MemorySpace.VMEM
    resident = lambda i: (0, 0)  # constant index_map -> stays VMEM-resident over tiles

    return pl.pallas_call(
        actor_kernel,
        out_shape=jax.ShapeDtypeStruct((batch, action_dim), jnp.float32),
        grid=(n_tiles,),
        in_specs=[
            pl.BlockSpec((tb, state_dim), lambda i: (i, 0), memory_space=vmem),
            pl.BlockSpec(w1.shape, resident, memory_space=vmem),
            pl.BlockSpec(b1.shape, resident, memory_space=vmem),
            pl.BlockSpec(w2.shape, resident, memory_space=vmem),
            pl.BlockSpec(b2.shape, resident, memory_space=vmem),
            pl.BlockSpec(w3.shape, resident, memory_space=vmem),
            pl.BlockSpec(b3.shape, resident, memory_space=vmem),
        ],
        out_specs=pl.BlockSpec((tb, action_dim), lambda i: (i, 0), memory_space=vmem),
        compiler_params=pltpu.CompilerParams(dimension_semantics=("parallel",)),
    )(x.astype(jnp.float32), w1, b1, w2, b2, w3, b3)


def init_actor_params(key, state_dim, action_dim, hidden=64):
    """Deterministic init mimicking nn.Linear's uniform(-1/sqrt(fan_in), 1/sqrt(fan_in)).
    Weights stored as [in_features, out_features] (transposed vs. PyTorch)."""
    ks = jax.random.split(key, 6)

    def linear(kw, kb, fan_in, fan_out):
        bound = 1.0 / jnp.sqrt(jnp.float32(fan_in))
        w = jax.random.uniform(kw, (fan_in, fan_out), jnp.float32, -bound, bound)
        b = jax.random.uniform(kb, (1, fan_out), jnp.float32, -bound, bound)
        return w, b

    w1, b1 = linear(ks[0], ks[1], state_dim, hidden)
    w2, b2 = linear(ks[2], ks[3], hidden, hidden)
    w3, b3 = linear(ks[4], ks[5], hidden, action_dim)
    return {"w1": w1, "b1": b1, "w2": w2, "b2": b2, "w3": w3, "b3": b3}


if __name__ == "__main__":
    key = jax.random.PRNGKey(0)
    k_params, k_x = jax.random.split(key)

    batch, state_dim, action_dim = 8, 16, 8
    params = init_actor_params(k_params, state_dim, action_dim)
    x = jax.random.normal(k_x, (batch, state_dim), jnp.float32)

    probs = actor_forward(x, params)
    probs = jax.block_until_ready(probs)

    # Sanity check against pure-JAX reference.
    def ref(x, p):
        h = jnp.maximum(x @ p["w1"] + p["b1"], 0.0)
        h = jnp.maximum(h @ p["w2"] + p["b2"], 0.0)
        return jax.nn.softmax(h @ p["w3"] + p["b3"], axis=-1)

    expected = ref(x, params)
    assert probs.shape == (batch, action_dim)
    assert jnp.allclose(probs, expected, atol=2e-5), "mismatch vs reference"
    assert jnp.allclose(jnp.sum(probs, axis=-1), 1.0, atol=2e-5), "softmax rows must sum to 1"

    print("KERNEL_OK")
</pallas_src>

<mosaic_0001>
module attributes {stable_mosaic.version = 11 : i64} {
  func.func @actor_kernel(%arg0: i32, %arg1: memref<8x16xf32, #tpu.memory_space<vmem>>, %arg2: memref<16x64xf32, #tpu.memory_space<vmem>>, %arg3: memref<1x64xf32, #tpu.memory_space<vmem>>, %arg4: memref<64x64xf32, #tpu.memory_space<vmem>>, %arg5: memref<1x64xf32, #tpu.memory_space<vmem>>, %arg6: memref<64x8xf32, #tpu.memory_space<vmem>>, %arg7: memref<1x8xf32, #tpu.memory_space<vmem>>, %arg8: memref<8x8xf32, #tpu.memory_space<vmem>>) attributes {dimension_semantics = [#tpu.dimension_semantics<parallel>], iteration_bounds = array<i64: 1>, scalar_prefetch = 0 : i64, scratch_operands = 0 : i64, tpu.core_type = #tpu.core_type<tc>, window_params = [{transform_indices = @transform_0, window_bounds = array<i64: 8, 16>}, {pipeline_mode = #tpu.pipeline_mode<synchronous>, transform_indices = @transform_1, window_bounds = array<i64: 16, 64>}, {pipeline_mode = #tpu.pipeline_mode<synchronous>, transform_indices = @transform_2, window_bounds = array<i64: 1, 64>}, {pipeline_mode = #tpu.pipeline_mode<synchronous>, transform_indices = @transform_3, window_bounds = array<i64: 64, 64>}, {pipeline_mode = #tpu.pipeline_mode<synchronous>, transform_indices = @transform_4, window_bounds = array<i64: 1, 64>}, {pipeline_mode = #tpu.pipeline_mode<synchronous>, transform_indices = @transform_5, window_bounds = array<i64: 64, 8>}, {pipeline_mode = #tpu.pipeline_mode<synchronous>, transform_indices = @transform_6, window_bounds = array<i64: 1, 8>}, {transform_indices = @transform_7, window_bounds = array<i64: 8, 8>}]} {
    %c0 = arith.constant 0 : index
    %c0_0 = arith.constant 0 : index
    %0 = vector.load %arg1[%c0, %c0_0] : memref<8x16xf32, #tpu.memory_space<vmem>>, vector<8x16xf32>
    %c0_1 = arith.constant 0 : index
    %c0_2 = arith.constant 0 : index
    %1 = vector.load %arg2[%c0_1, %c0_2] : memref<16x64xf32, #tpu.memory_space<vmem>>, vector<16x64xf32>
    %cst = arith.constant dense<0.000000e+00> : vector<8x64xf32>
    %2 = tpu.matmul %0, %1, %cst {dimension_numbers = #tpu.dot_dimension_numbers<[1], [0], [0], [1], [0, 0, 1, 1], [], []>} : vector<8x16xf32>, vector<16x64xf32>, vector<8x64xf32> -> vector<8x64xf32>
    %c0_3 = arith.constant 0 : index
    %c0_4 = arith.constant 0 : index
    %3 = vector.load %arg3[%c0_3, %c0_4] : memref<1x64xf32, #tpu.memory_space<vmem>>, vector<1x64xf32>
    %4 = vector.broadcast %3 : vector<1x64xf32> to vector<8x64xf32>
    %5 = arith.addf %2, %4 : vector<8x64xf32>
    %cst_5 = arith.constant 0.000000e+00 : f32
    %6 = vector.broadcast %cst_5 : f32 to vector<8x64xf32>
    %7 = arith.maximumf %5, %6 : vector<8x64xf32>
    %c0_6 = arith.constant 0 : index
    %c0_7 = arith.constant 0 : index
    %8 = vector.load %arg4[%c0_6, %c0_7] : memref<64x64xf32, #tpu.memory_space<vmem>>, vector<64x64xf32>
    %cst_8 = arith.constant dense<0.000000e+00> : vector<8x64xf32>
    %9 = tpu.matmul %7, %8, %cst_8 {dimension_numbers = #tpu.dot_dimension_numbers<[1], [0], [0], [1], [0, 0, 1, 1], [], []>} : vector<8x64xf32>, vector<64x64xf32>, vector<8x64xf32> -> vector<8x64xf32>
    %c0_9 = arith.constant 0 : index
    %c0_10 = arith.constant 0 : index
    %10 = vector.load %arg5[%c0_9, %c0_10] : memref<1x64xf32, #tpu.memory_space<vmem>>, vector<1x64xf32>
    %11 = vector.broadcast %10 : vector<1x64xf32> to vector<8x64xf32>
    %12 = arith.addf %9, %11 : vector<8x64xf32>
    %cst_11 = arith.constant 0.000000e+00 : f32
    %13 = vector.broadcast %cst_11 : f32 to vector<8x64xf32>
    %14 = arith.maximumf %12, %13 : vector<8x64xf32>
    %c0_12 = arith.constant 0 : index
    %c0_13 = arith.constant 0 : index
    %15 = vector.load %arg6[%c0_12, %c0_13] : memref<64x8xf32, #tpu.memory_space<vmem>>, vector<64x8xf32>
    %cst_14 = arith.constant dense<0.000000e+00> : vector<8x8xf32>
    %16 = tpu.matmul %14, %15, %cst_14 {dimension_numbers = #tpu.dot_dimension_numbers<[1], [0], [0], [1], [0, 0, 1, 1], [], []>} : vector<8x64xf32>, vector<64x8xf32>, vector<8x8xf32> -> vector<8x8xf32>
    %c0_15 = arith.constant 0 : index
    %c0_16 = arith.constant 0 : index
    %17 = vector.load %arg7[%c0_15, %c0_16] : memref<1x8xf32, #tpu.memory_space<vmem>>, vector<1x8xf32>
    %18 = vector.broadcast %17 : vector<1x8xf32> to vector<8x8xf32>
    %19 = arith.addf %16, %18 : vector<8x8xf32>
    %cst_17 = arith.constant dense<0xFF800000> : vector<8xf32>
    %20 = vector.multi_reduction <maximumf>, %19, %cst_17 [1] : vector<8x8xf32> to vector<8xf32>
    %21 = vector.shape_cast %20 : vector<8xf32> to vector<8x1xf32>
    %22 = vector.broadcast %21 : vector<8x1xf32> to vector<8x8xf32>
    %23 = arith.subf %19, %22 : vector<8x8xf32>
    %24 = math.exp %23 : vector<8x8xf32>
    %cst_18 = arith.constant dense<0.000000e+00> : vector<8xf32>
    %25 = vector.multi_reduction <add>, %24, %cst_18 [1] : vector<8x8xf32> to vector<8xf32>
    %26 = vector.shape_cast %25 : vector<8xf32> to vector<8x1xf32>
    %27 = tpu.reciprocal %26 {approx = true} : vector<8x1xf32> -> vector<8x1xf32>
    %28 = arith.mulf %26, %27 : vector<8x1xf32>
    %cst_19 = arith.constant 2.000000e+00 : f32
    %29 = vector.broadcast %cst_19 : f32 to vector<8x1xf32>
    %30 = arith.subf %29, %28 : vector<8x1xf32>
    %31 = arith.mulf %27, %30 : vector<8x1xf32>
    %32 = vector.broadcast %31 : vector<8x1xf32> to vector<8x8xf32>
    %33 = arith.mulf %24, %32 : vector<8x8xf32>
    %c0_20 = arith.constant 0 : index
    %c0_21 = arith.constant 0 : index
    %34 = vector.load %arg8[%c0_20, %c0_21] : memref<8x8xf32, #tpu.memory_space<vmem>>, vector<8x8xf32>
    tpu.vector_store %arg8[%c0_20, %c0_21], %33 {strides = array<i32>} : memref<8x8xf32, #tpu.memory_space<vmem>>, vector<8x8xf32>,
    return
  }
  func.func @transform_0(%arg0: i32) -> (i32, i32) {
    %c0_i32 = arith.constant 0 : i32
    %c0_i32_0 = arith.constant 0 : i32
    return %arg0, %c0_i32 : i32, i32
  }
  func.func @transform_1(%arg0: i32) -> (i32, i32) {
    %c0_i32 = arith.constant 0 : i32
    %c0_i32_0 = arith.constant 0 : i32
    %c0_i32_1 = arith.constant 0 : i32
    return %c0_i32, %c0_i32_0 : i32, i32
  }
  func.func @transform_2(%arg0: i32) -> (i32, i32) {
    %c0_i32 = arith.constant 0 : i32
    %c0_i32_0 = arith.constant 0 : i32
    %c0_i32_1 = arith.constant 0 : i32
    return %c0_i32, %c0_i32_0 : i32, i32
  }
  func.func @transform_3(%arg0: i32) -> (i32, i32) {
    %c0_i32 = arith.constant 0 : i32
    %c0_i32_0 = arith.constant 0 : i32
    %c0_i32_1 = arith.constant 0 : i32
    return %c0_i32, %c0_i32_0 : i32, i32
  }
  func.func @transform_4(%arg0: i32) -> (i32, i32) {
    %c0_i32 = arith.constant 0 : i32
    %c0_i32_0 = arith.constant 0 : i32
    %c0_i32_1 = arith.constant 0 : i32
    return %c0_i32, %c0_i32_0 : i32, i32
  }
  func.func @transform_5(%arg0: i32) -> (i32, i32) {
    %c0_i32 = arith.constant 0 : i32
    %c0_i32_0 = arith.constant 0 : i32
    %c0_i32_1 = arith.constant 0 : i32
    return %c0_i32, %c0_i32_0 : i32, i32
  }
  func.func @transform_6(%arg0: i32) -> (i32, i32) {
    %c0_i32 = arith.constant 0 : i32
    %c0_i32_0 = arith.constant 0 : i32
    %c0_i32_1 = arith.constant 0 : i32
    return %c0_i32, %c0_i32_0 : i32, i32
  }
  func.func @transform_7(%arg0: i32) -> (i32, i32) {
    %c0_i32 = arith.constant 0 : i32
    %c0_i32_0 = arith.constant 0 : i32
    return %arg0, %c0_i32 : i32, i32
  }
}

</mosaic_0001>

<bundles_post_ra>
// kernel: tpu_custom_call.1
= control target key start
LH: loop header
LB: loop body
LE: loop exit
PB: predicated region body
PF: predicated region fallthrough
CT: control target
= control target key end

     0   :  { %12 = vsyncpa [#allocation3], 0  ;;  %s627_s0 = inlined_call_operand.hbm [shape: f32[8,16], index: 0, kind: input, shape index: {}]   ;;  %s628_s1 = inlined_call_operand.vmem [shape: f32[16,64], index: 1, kind: input, shape index: {}]   ;;  %s629_s2 = inlined_call_operand.vmem [shape: f32[1,64], index: 2, kind: input, shape index: {}]   ;;  %s630_s3 = inlined_call_operand.vmem [shape: f32[64,64], index: 3, kind: input, shape index: {}]   ;;  %s631_s4 = inlined_call_operand.vmem [shape: f32[1,64], index: 4, kind: input, shape index: {}]   ;;  %s632_s5 = inlined_call_operand.vmem [shape: f32[64,8], index: 5, kind: input, shape index: {}]   ;;  %s633_s6 = inlined_call_operand.vmem [shape: f32[1,8], index: 6, kind: input, shape index: {}]   ;;  %s634_s7 = inlined_call_operand.hbm [shape: f32[8,8], index: 7, kind: output, shape index: {}]  }
   0x1   :  { %13 = vsyncpa [#allocation4], 0  ;;  %s489_s24 = smov [#allocation2]   ;;  %s441_s28 = scalar_lea.hbm %s627_s0, 128 }
   0x2   :  { %s20_s25 = sshll.u32 %s489_s24, 4  ;;  %p442_p0 = scmp.ne.s32.totalorder %s627_s0, %s441_s28  ;;  %s21_s25 = int_to_ptr.vmem [resolvable:$true] %s20_s25 }
   0x3   :  { %p445_p1 = scmp.lt.u32.totalorder %s441_s28, %s627_s0 }
   0x5   :  { %p447_p2 = pnand %p445_p1, %p442_p0 }
   0x7   :  { %450 = shalt.err (!%p447_p2)
}
   0x8   :  { %s451_s10 = scalar_lea.vmem %s21_s25, 128  ;;  %p456_p4 = scmp.lt.s32.totalorder %s21_s25, %s21_s25 }
   0x9   :  { %p452_p3 = scmp.ne.s32.totalorder %s21_s25, %s451_s10  ;;  %p457_p5 = scmp.lt.s32.totalorder %s451_s10, %s451_s10 }
   0xb   :  { %p458_p6 = por %p457_p5, %p456_p4 }
   0xd   :  { %p459_p7 = pnand %p458_p6, %p452_p3 }
   0xf   :  { %462 = shalt.err (!%p459_p7)
}
  0x10   :  { %23 = dma.hbm_to_vmem [thread:$0]  %s627_s0, 128, %s21_s25, [#allocation3]  }
  0x11   :  { %485 = dma.done.wait [#allocation3], 128  }
  0x12   :  { %486 = vsyncadd [#allocation3], 4294967168  ;;  %v490_v0 = vmov 0.0|0.0   ;;  %vm491_vm0 = vmmov 0   ;;  %v492_v1 = vmov 0.0   ;;  %v40_v2 = vld [vmem:[%s628_s1] sm:$0xff] }
  0x13   :  { %405 = vmatprep.subr.bf16.mxu0 %v490_v0  ;;  %364 = vmatprep.mubr.msk.f32.mxu0 %vm491_vm0, %v492_v1  ;;  %v41_v3 = vld [vmem:[%s628_s1 + $0x8] sm:$0xff]  ;;  %v124_v5 = vld [vmem:[%s630_s3] sm:$0xff]  ;;  %v126_v7 = vld [vmem:[%s630_s3 + $0x10] sm:$0xff]  ;;  %vm49_vm1 = vcmask 130048   ;;  %vm139_vm2 = vcmask 523264   ;;  %vm302_vm3 = vcmask 64512  }
  0x14   :  { %408 = vmatprep.subr.bf16.mxu1 %v490_v0  ;;  %383 = vmatprep.mubr.msk.f32.mxu1 %vm491_vm0, %v492_v1  ;;  %v406_v4 = vpack.c.bf16 %v41_v3, %v40_v2  ;;  %v125_v6 = vld [vmem:[%s630_s3 + $0x8] sm:$0xff]  ;;  %v127_v9 = vld [vmem:[%s630_s3 + $0x18] sm:$0xff]  ;;  %v39_v10 = vld [vmem:[#allocation2] sm:$0xff] }
  0x15   :  { %v409_v8 = vpack.c.bf16 %v125_v6, %v124_v5  ;;  %v412_v11 = vpack.c.bf16 %v127_v9, %v126_v7  ;;  %v128_v12 = vld [vmem:[%s630_s3 + $0x20] sm:$0xff]  ;;  %v129_v13 = vld [vmem:[%s630_s3 + $0x28] sm:$0xff]  ;;  %v130_v15 = vld [vmem:[%s630_s3 + $0x30] sm:$0xff] }
  0x16   :  { %407 = vmatpush3.bf16.msra.mxu0 %v406_v4  ;;  %v415_v14 = vpack.c.bf16 %v129_v13, %v128_v12  ;;  %v131_v16 = vld [vmem:[%s630_s3 + $0x38] sm:$0xff]  ;;  %v214_v18 = vld [vmem:[%s632_s5] sm:$0xff]  ;;  %v215_v19 = vld [vmem:[%s632_s5 + $0x8] sm:$0xff] }
  0x17   :  { %410 = vmatpush3.bf16.msra.mxu1 %v409_v8  ;;  %420 = vmatprep.subr.bf16.mxu0 %v490_v0  ;;  %v418_v17 = vpack.c.bf16 %v131_v16, %v130_v15  ;;  %v216_v20 = vld [vmem:[%s632_s5 + $0x10] sm:$0xff]  ;;  %v421_v21 = vpack.c.bf16 %v215_v19, %v214_v18  ;;  %v217_v22 = vld [vmem:[%s632_s5 + $0x18] sm:$0xff]  ;;  %v218_v24 = vld [vmem:[%s632_s5 + $0x20] sm:$0xff] }
  0x18   :  { %411 = vmatprep.subr.bf16.mxu1 %v490_v0  ;;  %v424_v23 = vpack.c.bf16 %v217_v22, %v216_v20  ;;  %v219_v25 = vld [vmem:[%s632_s5 + $0x28] sm:$0xff]  ;;  %v333_v27 = vld [vmem:[%s629_s2] ss:$0 sm:$0xff]  ;;  %v220_v32 = vld [vmem:[%s632_s5 + $0x30] sm:$0xff] }
  0x19   :  { %365 = vmatmul.mubr.msk.f32.vlgmr.msra.gmra.mrb[0].mxu0 %vm49_vm1, %v39_v10  ;;  %v427_v26 = vpack.c.bf16 %v219_v25, %v218_v24  ;;  %v221_v33 = vld [vmem:[%s632_s5 + $0x38] sm:$0xff]  ;;  %v335_v35 = vld [vmem:[%s631_s4] ss:$0 sm:$0xff]  ;;  %s493_s4 = smov [#allocation5]  }
  0x1a   :  { %402 = vmatprep.mubr.msk.f32.mxu0 %vm491_vm0, %v492_v1  ;;  %422 = vmatpush3.bf16.msra.mxu0 %v421_v21  ;;  %v430_v34 = vpack.c.bf16 %v221_v33, %v220_v32  ;;  %v337_v40 = vld [vmem:[%s633_s6] ss:$0 sm:$0xff]  ;;  %s324_s5 = sshll.u32 %s493_s4, 4  ;;  %s325_s5 = int_to_ptr.vmem [resolvable:$true] %s324_s5 }
  0x1b   :  { %413 = vmatpush3.bf16.msra.mxu1 %v412_v11  ;;  %423 = vmatprep.subr.bf16.mxu0 %v490_v0  ;;  %s463_s6 = scalar_lea.vmem %s325_s5, 128  ;;  %p468_p9 = scmp.lt.s32.totalorder %s325_s5, %s325_s5 }
  0x1c   :  { %414 = vmatprep.subr.bf16.mxu1 %v490_v0  ;;  %p464_p8 = scmp.ne.s32.totalorder %s325_s5, %s463_s6  ;;  %p469_p10 = scmp.lt.s32.totalorder %s463_s6, %s463_s6 }
  0x1e   :  { %425 = vmatpush3.bf16.msra.mxu0 %v424_v23  ;;  %p470_p11 = por %p469_p10, %p468_p9 }
  0x1f   :  { %416 = vmatpush3.bf16.msra.mxu1 %v415_v14  ;;  %426 = vmatprep.subr.bf16.mxu0 %v490_v0 }
  0x20   :  { %417 = vmatprep.subr.bf16.mxu1 %v490_v0  ;;  %p471_p12 = pnand %p470_p11, %p464_p8 }
  0x22   :  { %428 = vmatpush3.bf16.msra.mxu0 %v427_v26 }
  0x23   :  { %419 = vmatpush3.bf16.msra.mxu1 %v418_v17  ;;  %429 = vmatprep.subr.bf16.mxu0 %v490_v0 }
  0x26   :  { %431 = vmatpush3.bf16.msra.mxu0 %v430_v34 }
  0xec   :  { %v119_v28 = vpop.f32.mrb[0].mxu0 }
  0xed   :  { %v120_v29 = vadd.f32 %v333_v27, %v119_v28  ;;  %v366_v30 = vpop.f32.mrb[1].mxu0 }
  0xef   :  { %v123_v31 = vmax.f32 %v120_v29, 0.0 }
  0xf1   :  { %384 = vmatmul.mubr.msk.f32.vlgmr.msra.gmra.mrb[0].mxu1 %vm139_vm2, %v123_v31 }
 0x1c4   :  { %v209_v36 = vpop.f32.mrb[0].mxu1 }
 0x1c5   :  { %v210_v37 = vadd.f32 %v335_v35, %v209_v36  ;;  %v385_v38 = vpop.f32.mrb[1].mxu1 }
 0x1c7   :  { %v213_v39 = vmax.f32 %v210_v37, 0.0 }
 0x1c9   :  { %403 = vmatmul.mubr.msk.f32.vlgmr.msra.gmra.mrb[2].mxu0 %vm139_vm2, %v213_v39 }
 0x29c   :  { %v298_v41 = vpop.f32.mrb[2].mxu0 }
 0x29d   :  { %v299_v42 = vadd.f32 %v337_v40, %v298_v41  ;;  %v404_v43 = vpop.f32.mrb[3].mxu0 }
 0x29f   :  { %v303_v44 = vsel %vm302_vm3, %v299_v42, -inf }
 0x2a0   :  { %304 = vmax.xlane.f32.xlu0 %v303_v44 }
 0x32d   :  { %v305_v45 = vpop.xlane.xlu0 %304 }
 0x32e   :  { %v306_v46 = vsub.f32 %v299_v42, %v305_v45 }
 0x330   :  { %v307_v47 = vmul.f32 1.442695, %v306_v46 }
 0x332   :  { %437 = vpow2.f32 %v307_v47 }
 0x33c   :  { %v438_v48 = vpop.eup %437 }
 0x33d   :  { %v309_v49 = vsel %vm302_vm3, %v438_v48, 0.0 }
 0x33e   :  { %310 = vadd.xlane.f32.xlu0 %v309_v49 }
 0x3cb   :  { %v311_v50 = vpop.xlane.xlu0 %310 }
 0x3cc   :  { %439 = vrcp.f32 %v311_v50 }
 0x3d6   :  { %v440_v51 = vpop.eup %439 }
 0x3d7   :  { %v313_v52 = vmul.f32 %v440_v51, %v311_v50 }
 0x3d9   :  { %v314_v53 = vsub.f32 2.0, %v313_v52 }
 0x3db   :  { %v315_v54 = vmul.f32 %v440_v51, %v314_v53 }
 0x3dd   :  { %v316_v55 = vmul.f32 %v438_v48, %v315_v54 }
 0x3df   :  { %317 = vst.msk [vmem:[#allocation5] sm:$0xff] %vm302_vm3, %v316_v55 }
 0x3e0   :  { %474 = shalt.err (!%p471_p12)
}
 0x3e1   :  { %s475_s28 = scalar_lea.hbm %s634_s7, 128 }
 0x3e2   :  { %p476_p13 = scmp.ne.s32.totalorder %s634_s7, %s475_s28  ;;  %p479_p0 = scmp.lt.u32.totalorder %s475_s28, %s634_s7 }
 0x3e4   :  { %p481_p1 = pnand %p479_p0, %p476_p13 }
 0x3e6   :  { %484 = shalt.err (!%p481_p1)
}
 0x3e7   :  { %327 = dma.vmem_to_hbm [thread:$0]  %s325_s5, 128, %s634_s7, [#allocation4]  }
 0x3e8   :  { %487 = dma.done.wait [#allocation4], 128  }
 0x3e9   :  { %488 = vsyncadd [#allocation4], 4294967168 }
 0x3ea   :  { %331 = vsyncpa [#allocation3], 1 }
 0x3eb   :  { %332 = vsyncpa [#allocation4], 1 }

</bundles_post_ra>
